<compile_context>
chip_gen: v5e
topology: v5e:2x2
jax: 0.10.0
libtpu: 0.0.40
codegen_flags: <defaults>
</compile_context>

<pallas_src>
import jax
import jax.numpy as jnp
from jax.experimental import pallas as pl
from jax.experimental.pallas import tpu as pltpu


def _mlp_kernel(x_ref, w1_ref, b1_ref, w2_ref, b2_ref, o_ref):
    # First linear: bf16 x bf16 on the MXU, f32 accumulate.
    h = jnp.dot(x_ref[...], w1_ref[...], preferred_element_type=jnp.float32)
    # Bias + ReLU in f32 on the VPU.
    h = jnp.maximum(h + b1_ref[...], 0.0)
    # Second linear: cast activations to bf16 for the MXU, f32 accumulate.
    out = jnp.dot(h.astype(w2_ref.dtype), w2_ref[...],
                  preferred_element_type=jnp.float32)
    o_ref[...] = (out + b2_ref[...]).astype(o_ref.dtype)


def personality_model_forward(x, w1, b1, w2, b2, *, tm=256):
    """x: [B, input_size] f32 -> [B, num_classes] f32 (same math as the module)."""
    B, D_in = x.shape
    H = w1.shape[1]
    C = w2.shape[1]

    # Lane-dense output: pad num_classes up to a multiple of 128.
    C_pad = max(128, ((C + 127) // 128) * 128)

    # Batch tile: multiple of 8 sublanes; don't blow tiny batches up to tm.
    TM = min(tm, max(8, ((B + 7) // 8) * 8))
    B_pad = ((B + TM - 1) // TM) * TM

    # Pad batch (zeros) and output features (zero weight/bias columns).
    x_p = jnp.pad(x, ((0, B_pad - B), (0, 0))) if B_pad != B else x
    w2_p = jnp.pad(w2, ((0, 0), (0, C_pad - C))) if C_pad != C else w2
    b2_p = jnp.pad(b2, ((0, C_pad - C),)) if C_pad != C else b2

    # bf16 MXU inputs; biases stay f32 (kept as 2-D rows for clean VMEM layout).
    x_bf = x_p.astype(jnp.bfloat16)
    w1_bf = w1.astype(jnp.bfloat16)
    w2_bf = w2_p.astype(jnp.bfloat16)
    b1_2d = b1.reshape(1, H).astype(jnp.float32)
    b2_2d = b2_p.reshape(1, C_pad).astype(jnp.float32)

    grid = (B_pad // TM,)

    out = pl.pallas_call(
        _mlp_kernel,
        out_shape=jax.ShapeDtypeStruct((B_pad, C_pad), jnp.float32),
        grid=grid,
        in_specs=[
            pl.BlockSpec((TM, D_in), lambda i: (i, 0)),   # x tile marches over batch
            pl.BlockSpec((D_in, H), lambda i: (0, 0)),    # W1 resident
            pl.BlockSpec((1, H), lambda i: (0, 0)),       # b1 resident
            pl.BlockSpec((H, C_pad), lambda i: (0, 0)),   # W2 resident
            pl.BlockSpec((1, C_pad), lambda i: (0, 0)),   # b2 resident
        ],
        out_specs=pl.BlockSpec((TM, C_pad), lambda i: (i, 0)),
        compiler_params=pltpu.CompilerParams(
            dimension_semantics=("parallel",),            # v7x: shard tiles over 2 TCs
            vmem_limit_bytes=32 * 1024 * 1024,            # safe on v5e/v6e/v7x
        ),
    )(x_bf, w1_bf, b1_2d, w2_bf, b2_2d)

    return out[:B, :C]


if __name__ == "__main__":
    # Small shapes consistent with the module's forward: [batch, input_size]
    batch = 8
    input_size = 32
    hidden = 256          # fixed by the module definition
    num_classes = 16

    key = jax.random.PRNGKey(0)
    kx, kw1, kb1, kw2, kb2 = jax.random.split(key, 5)

    x = jax.random.normal(kx, (batch, input_size), dtype=jnp.float32)
    w1 = jax.random.normal(kw1, (input_size, hidden), dtype=jnp.float32) * 0.05
    b1 = jax.random.normal(kb1, (hidden,), dtype=jnp.float32) * 0.01
    w2 = jax.random.normal(kw2, (hidden, num_classes), dtype=jnp.float32) * 0.05
    b2 = jax.random.normal(kb2, (num_classes,), dtype=jnp.float32) * 0.01

    out = personality_model_forward(x, w1, b1, w2, b2)
    jax.block_until_ready(out)
    assert out.shape == (batch, num_classes)

    # Tight check against a reference mirroring the kernel's bf16 MXU inputs
    # with f32 accumulation.
    xb = x.astype(jnp.bfloat16).astype(jnp.float32)
    w1b = w1.astype(jnp.bfloat16).astype(jnp.float32)
    w2b = w2.astype(jnp.bfloat16).astype(jnp.float32)
    h = jnp.maximum(xb @ w1b + b1, 0.0)
    ref_bf16 = h.astype(jnp.bfloat16).astype(jnp.float32) @ w2b + b2
    assert jnp.allclose(out, ref_bf16, atol=1e-3, rtol=1e-3)

    # Looser sanity check against the exact f32 module math.
    ref_f32 = jnp.maximum(x @ w1 + b1, 0.0) @ w2 + b2
    assert jnp.allclose(out, ref_f32, atol=2e-2, rtol=2e-2)

    print("KERNEL_OK")
</pallas_src>

<mosaic_0001>
module attributes {stable_mosaic.version = 11 : i64} {
  func.func @_mlp_kernel(%arg0: i32, %arg1: memref<8x32xbf16, #tpu.memory_space<vmem>>, %arg2: memref<32x256xbf16, #tpu.memory_space<vmem>>, %arg3: memref<1x256xf32, #tpu.memory_space<vmem>>, %arg4: memref<256x128xbf16, #tpu.memory_space<vmem>>, %arg5: memref<1x128xf32, #tpu.memory_space<vmem>>, %arg6: memref<8x128xf32, #tpu.memory_space<vmem>>) attributes {dimension_semantics = [#tpu.dimension_semantics<parallel>], iteration_bounds = array<i64: 1>, scalar_prefetch = 0 : i64, scratch_operands = 0 : i64, tpu.core_type = #tpu.core_type<tc>, window_params = [{transform_indices = @transform_0, window_bounds = array<i64: 8, 32>}, {pipeline_mode = #tpu.pipeline_mode<synchronous>, transform_indices = @transform_1, window_bounds = array<i64: 32, 256>}, {pipeline_mode = #tpu.pipeline_mode<synchronous>, transform_indices = @transform_2, window_bounds = array<i64: 1, 256>}, {pipeline_mode = #tpu.pipeline_mode<synchronous>, transform_indices = @transform_3, window_bounds = array<i64: 256, 128>}, {pipeline_mode = #tpu.pipeline_mode<synchronous>, transform_indices = @transform_4, window_bounds = array<i64: 1, 128>}, {transform_indices = @transform_5, window_bounds = array<i64: 8, 128>}]} {
    %c0 = arith.constant 0 : index
    %c0_0 = arith.constant 0 : index
    %0 = vector.load %arg1[%c0, %c0_0] : memref<8x32xbf16, #tpu.memory_space<vmem>>, vector<8x32xbf16>
    %c0_1 = arith.constant 0 : index
    %c0_2 = arith.constant 0 : index
    %1 = vector.load %arg2[%c0_1, %c0_2] : memref<32x256xbf16, #tpu.memory_space<vmem>>, vector<32x256xbf16>
    %cst = arith.constant dense<0.000000e+00> : vector<8x256xf32>
    %2 = tpu.matmul %0, %1, %cst {dimension_numbers = #tpu.dot_dimension_numbers<[1], [0], [0], [1], [0, 0, 1, 1], [], []>} : vector<8x32xbf16>, vector<32x256xbf16>, vector<8x256xf32> -> vector<8x256xf32>
    %c0_3 = arith.constant 0 : index
    %c0_4 = arith.constant 0 : index
    %3 = vector.load %arg3[%c0_3, %c0_4] : memref<1x256xf32, #tpu.memory_space<vmem>>, vector<1x256xf32>
    %4 = vector.broadcast %3 : vector<1x256xf32> to vector<8x256xf32>
    %5 = arith.addf %2, %4 : vector<8x256xf32>
    %cst_5 = arith.constant 0.000000e+00 : f32
    %6 = vector.broadcast %cst_5 : f32 to vector<8x256xf32>
    %7 = arith.maximumf %5, %6 : vector<8x256xf32>
    %8 = arith.truncf %7 : vector<8x256xf32> to vector<8x256xbf16>
    %c0_6 = arith.constant 0 : index
    %c0_7 = arith.constant 0 : index
    %9 = vector.load %arg4[%c0_6, %c0_7] : memref<256x128xbf16, #tpu.memory_space<vmem>>, vector<256x128xbf16>
    %cst_8 = arith.constant dense<0.000000e+00> : vector<8x128xf32>
    %10 = tpu.matmul %8, %9, %cst_8 {dimension_numbers = #tpu.dot_dimension_numbers<[1], [0], [0], [1], [0, 0, 1, 1], [], []>} : vector<8x256xbf16>, vector<256x128xbf16>, vector<8x128xf32> -> vector<8x128xf32>
    %c0_9 = arith.constant 0 : index
    %c0_10 = arith.constant 0 : index
    %11 = vector.load %arg5[%c0_9, %c0_10] : memref<1x128xf32, #tpu.memory_space<vmem>>, vector<1x128xf32>
    %12 = vector.broadcast %11 : vector<1x128xf32> to vector<8x128xf32>
    %13 = arith.addf %10, %12 : vector<8x128xf32>
    %c0_11 = arith.constant 0 : index
    %c0_12 = arith.constant 0 : index
    %14 = vector.load %arg6[%c0_11, %c0_12] : memref<8x128xf32, #tpu.memory_space<vmem>>, vector<8x128xf32>
    tpu.vector_store %arg6[%c0_11, %c0_12], %13 {strides = array<i32>} : memref<8x128xf32, #tpu.memory_space<vmem>>, vector<8x128xf32>,
    return
  }
  func.func @transform_0(%arg0: i32) -> (i32, i32) {
    %c0_i32 = arith.constant 0 : i32
    %c0_i32_0 = arith.constant 0 : i32
    return %arg0, %c0_i32 : i32, i32
  }
  func.func @transform_1(%arg0: i32) -> (i32, i32) {
    %c0_i32 = arith.constant 0 : i32
    %c0_i32_0 = arith.constant 0 : i32
    %c0_i32_1 = arith.constant 0 : i32
    return %c0_i32, %c0_i32_0 : i32, i32
  }
  func.func @transform_2(%arg0: i32) -> (i32, i32) {
    %c0_i32 = arith.constant 0 : i32
    %c0_i32_0 = arith.constant 0 : i32
    %c0_i32_1 = arith.constant 0 : i32
    return %c0_i32, %c0_i32_0 : i32, i32
  }
  func.func @transform_3(%arg0: i32) -> (i32, i32) {
    %c0_i32 = arith.constant 0 : i32
    %c0_i32_0 = arith.constant 0 : i32
    %c0_i32_1 = arith.constant 0 : i32
    return %c0_i32, %c0_i32_0 : i32, i32
  }
  func.func @transform_4(%arg0: i32) -> (i32, i32) {
    %c0_i32 = arith.constant 0 : i32
    %c0_i32_0 = arith.constant 0 : i32
    %c0_i32_1 = arith.constant 0 : i32
    return %c0_i32, %c0_i32_0 : i32, i32
  }
  func.func @transform_5(%arg0: i32) -> (i32, i32) {
    %c0_i32 = arith.constant 0 : i32
    %c0_i32_0 = arith.constant 0 : i32
    return %arg0, %c0_i32 : i32, i32
  }
}

</mosaic_0001>

<bundles_post_ra>
// kernel: tpu_custom_call.1
= control target key start
LH: loop header
LB: loop body
LE: loop exit
PB: predicated region body
PF: predicated region fallthrough
CT: control target
= control target key end

     0   :  { %10 = vsyncpa [#allocation3], 0  ;;  %s621_s0 = inlined_call_operand.hbm [shape: bf16[8,32], index: 0, kind: input, shape index: {}]   ;;  %s622_s1 = inlined_call_operand.hbm [shape: bf16[32,256], index: 1, kind: input, shape index: {}]   ;;  %s623_s2 = inlined_call_operand.hbm [shape: f32[1,256], index: 2, kind: input, shape index: {}]   ;;  %s624_s3 = inlined_call_operand.hbm [shape: bf16[256,128], index: 3, kind: input, shape index: {}]   ;;  %s625_s4 = inlined_call_operand.vmem [shape: f32[1,128], index: 4, kind: input, shape index: {}]   ;;  %s626_s5 = inlined_call_operand.hbm [shape: f32[8,128], index: 5, kind: output, shape index: {}]  }
   0x1   :  { %11 = vsyncpa [#allocation6], 0 }
   0x2   :  { %12 = vsyncpa [#allocation9], 0  ;;  %s29_s20 = sshll.u32 %s622_s1, 4  ;;  %s30_s20 = int_to_ptr.hbm [resolvable:$true] %s29_s20 }
   0x3   :  { %13 = vsyncpa [#allocation4], 0  ;;  %s564_s21 = smov [#allocation5]   ;;  %s19_s25 = sshll.u32 %s621_s0, 4  ;;  %s20_s25 = int_to_ptr.hbm [resolvable:$true] %s19_s25 }
   0x4   :  { %s31_s22 = sshll.u32 %s564_s21, 4  ;;  %s565_s26 = smov 128   ;;  %s32_s22 = int_to_ptr.vmem [resolvable:$true] %s31_s22 }
   0x5   :  { %s566_s27 = smov 8   ;;  %s567_s28 = smov [#allocation2]  }
   0x6   :  { %37 = dma.hbm_to_vmem [thread:$0]  %s30_s20, 512, %s32_s22, [#allocation6], %s565_s26, %s565_s26, %s566_s27  }
   0x7   :  { %s21_s29 = sshll.u32 %s567_s28, 4  ;;  %s43_s7 = sshll.u32 %s623_s2, 4  ;;  %s22_s29 = int_to_ptr.vmem [resolvable:$true] %s21_s29  ;;  %s44_s7 = int_to_ptr.hbm [resolvable:$true] %s43_s7 }
   0x8   :  { %24 = dma.hbm_to_vmem [thread:$0]  %s20_s25, 64, %s22_s29, [#allocation3]  }
   0x9   :  { %s53_s9 = sshll.u32 %s624_s3, 4  ;;  %s568_s10 = smov [#allocation7]   ;;  %s54_s9 = int_to_ptr.hbm [resolvable:$true] %s53_s9 }
   0xa   :  { %s45_s11 = sshll.u32 %s568_s10, 4  ;;  %s569_s0 = smov [#allocation8]   ;;  %s46_s11 = int_to_ptr.vmem [resolvable:$true] %s45_s11 }
   0xb   :  { %48 = dma.hbm_to_vmem [thread:$0]  %s44_s7, 32, %s46_s11, [#allocation6]  }
   0xc   :  { %s55_s12 = sshll.u32 %s569_s0, 4  ;;  %s570_s13 = smov 64   ;;  %s56_s12 = int_to_ptr.vmem [resolvable:$true] %s55_s12 }
   0xd   :  { %s571_s14 = smov 4  }
   0xe   :  { %61 = dma.hbm_to_vmem [thread:$0]  %s54_s9, 2048, %s56_s12, [#allocation9], %s570_s13, %s570_s13, %s571_s14  }
   0xf   :  { %556 = dma.done.wait [#allocation3], 64  }
  0x10   :  { %557 = vsyncadd [#allocation3], 4294967232 }
  0x11   :  { %558 = dma.done.wait [#allocation6], 544  }
  0x12   :  { %559 = vsyncadd [#allocation6], 4294966752 }
  0x13   :  { %560 = dma.done.wait [#allocation9], 2048  }
  0x14   :  { %561 = vsyncadd [#allocation9], 4294965248  ;;  %v334_v0 = vld [vmem:[#allocation5 + $0x10] sm:$0xf]  ;;  %v409_v1 = vld [vmem:[#allocation5 + $0x14] sm:$0xf0] }
  0x15   :  { %v408_v2 = vld [vmem:[#allocation5 + $0x14] sm:$0xf]  ;;  %v335_v3 = vor.u32 %v409_v1, %v334_v0  ;;  %v336_v4 = vld [vmem:[#allocation5 + $0x18] sm:$0xf0]  ;;  %v326_v5 = vld [vmem:[#allocation5] sm:$0xf] }
  0x16   :  { %v407_v6 = vld [vmem:[#allocation5 + $0x4] sm:$0xf0]  ;;  %v339_v7 = vor.u32 %v408_v2, %v336_v4  ;;  %v406_v8 = vld [vmem:[#allocation5 + $0x4] sm:$0xf]  ;;  %v328_v9 = vld [vmem:[#allocation5 + $0x8] sm:$0xf0] }
  0x17   :  { %122 = vmatpush.bf16.msra.mxu0 %v335_v3  ;;  %v327_v10 = vor.u32 %v407_v6, %v326_v5  ;;  %v417_v11 = vld [vmem:[#allocation8 + $0x38] sm:$0xff]  ;;  %v331_v13 = vor.u32 %v406_v8, %v328_v9  ;;  %v416_v14 = vld [vmem:[#allocation8 + $0x30] sm:$0xff]  ;;  %vm112_vm0 = vcmask 261120   ;;  %v415_v17 = vld [vmem:[#allocation8 + $0x28] sm:$0xff]  ;;  %s572_s15 = smov [#allocation10]   ;;  %s312_s19 = sshll.u32 %s626_s5, 4  ;;  %s313_s19 = int_to_ptr.hbm [resolvable:$true] %s312_s19 }
  0x18   :  { %v425_v12 = vld [vmem:[#allocation8 + $0x78] sm:$0xff]  ;;  %135 = vmatpush.bf16.msra.mxu1 %v339_v7  ;;  %278 = vmatpush.bf16.msra.mxu2 %v417_v11  ;;  %v424_v15 = vld [vmem:[#allocation8 + $0x70] sm:$0xff]  ;;  %v423_v18 = vld [vmem:[#allocation8 + $0x68] sm:$0xff]  ;;  %s310_s16 = sshll.u32 %s572_s15, 4  ;;  %s311_s16 = int_to_ptr.vmem [resolvable:$true] %s310_s16 }
  0x19   :  { %291 = vmatpush.bf16.msra.mxu3 %v425_v12  ;;  %v81_v16 = vld [vmem:[#allocation2] sm:$0xf]  ;;  %v414_v19 = vld [vmem:[#allocation8 + $0x20] sm:$0xff]  ;;  %v412_v23 = vld [vmem:[#allocation8 + $0x10] sm:$0xff] }
  0x1a   :  { %v422_v20 = vld [vmem:[#allocation8 + $0x60] sm:$0xff]  ;;  %v413_v21 = vld [vmem:[#allocation8 + $0x18] sm:$0xff]  ;;  %v420_v24 = vld [vmem:[#allocation8 + $0x50] sm:$0xff] }
  0x1b   :  { %123 = vmatpush.bf16.msra.mxu0 %v327_v10  ;;  %v421_v22 = vld [vmem:[#allocation8 + $0x58] sm:$0xff]  ;;  %v411_v25 = vld [vmem:[#allocation8 + $0x8] sm:$0xff]  ;;  %v410_v27 = vld [vmem:[#allocation8] sm:$0xff] }
  0x1c   :  { %136 = vmatpush.bf16.msra.mxu1 %v331_v13  ;;  %279 = vmatpush.bf16.msra.mxu2 %v416_v14  ;;  %v419_v26 = vld [vmem:[#allocation8 + $0x48] sm:$0xff]  ;;  %v418_v28 = vld [vmem:[#allocation8 + $0x40] sm:$0xff]  ;;  %v86_v29 = vld [vmem:[#allocation7] sm:$0x3] }
  0x1d   :  { %292 = vmatpush.bf16.msra.mxu3 %v424_v15  ;;  %v88_v30 = vperm.slane %v86_v29, 0  ;;  %v89_v31 = vperm.slane %v86_v29, 1  ;;  %v435_v42 = vld [vmem:[%s625_s4] ss:$0 sm:$0xff] }
  0x1e   :  { %340 = vmatmul.msk.bf16.vlgmr.msra.gmra.mxu0 %vm112_vm0, %v81_v16 }
  0x1f   :  { %341 = vmatmul.msk.bf16.vlgmr.msra.gmra.mxu1 %vm112_vm0, %v81_v16 }
  0x20   :  { %280 = vmatpush.bf16.msra.mxu2 %v415_v17 }
  0x21   :  { %293 = vmatpush.bf16.msra.mxu3 %v423_v18 }
  0x24   :  { %281 = vmatpush.bf16.msra.mxu2 %v414_v19 }
  0x25   :  { %294 = vmatpush.bf16.msra.mxu3 %v422_v20 }
  0x28   :  { %282 = vmatpush.bf16.msra.mxu2 %v413_v21 }
  0x29   :  { %295 = vmatpush.bf16.msra.mxu3 %v421_v22 }
  0x2c   :  { %283 = vmatpush.bf16.msra.mxu2 %v412_v23 }
  0x2d   :  { %296 = vmatpush.bf16.msra.mxu3 %v420_v24 }
  0x30   :  { %284 = vmatpush.bf16.msra.mxu2 %v411_v25 }
  0x31   :  { %297 = vmatpush.bf16.msra.mxu3 %v419_v26 }
  0x34   :  { %285 = vmatpush.bf16.msra.mxu2 %v410_v27 }
  0x35   :  { %298 = vmatpush.bf16.msra.mxu3 %v418_v28 }
  0x9b   :  { %v125_v32 = vpop.f32.mrf.mxu0 }
  0x9c   :  { %v126_v33 = vadd.f32 %v125_v32, %v88_v30  ;;  %v138_v34 = vpop.f32.mrf.mxu1 }
  0x9d   :  { %v139_v35 = vadd.f32 %v138_v34, %v89_v31 }
  0x9e   :  { %v142_v36 = vmax.f32 %v126_v33, 0.0 }
  0x9f   :  { %v143_v37 = vmax.f32 %v139_v35, 0.0 }
  0xa0   :  { %v144_v38 = vpack.c.bf16 %v142_v36, %v142_v36 }
  0xa1   :  { %v145_v39 = vpack.c.bf16 %v143_v37, %v143_v37 }
  0xa2   :  { %286 = vmatmul.bf16.vlgmr.msra.gmra.mxu2 %v144_v38 }
  0xa3   :  { %299 = vmatmul.bf16.vlgmr.msra.gmra.mxu3 %v145_v39  ;;  %v127_v40 = vpop.f32.mrf.mxu0 }
  0xa4   :  { %v140_v41 = vpop.f32.mrf.mxu1 }
 0x125   :  { %v287_v43 = vpop.f32.mrf.mxu2 }
 0x126   :  { %v288_v44 = vadd.f32 %v435_v42, %v287_v43  ;;  %v300_v45 = vpop.f32.mrf.mxu3 }
 0x128   :  { %v301_v46 = vadd.f32 %v300_v45, %v288_v44 }
 0x12a   :  { %304 = vst [vmem:[#allocation10] sm:$0xff] %v301_v46 }
 0x12b   :  { %315 = dma.vmem_to_hbm [thread:$0]  %s311_s16, 128, %s313_s19, [#allocation4]  }
 0x12d   :  { %v289_v47 = vpop.f32.mrf.mxu2 }
 0x12e   :  { %v302_v48 = vpop.f32.mrf.mxu3 }
 0x12f   :  { %562 = dma.done.wait [#allocation4], 128  }
 0x130   :  { %563 = vsyncadd [#allocation4], 4294967168 }
 0x131   :  { %320 = vsyncpa [#allocation3], 1 }
 0x132   :  { %321 = vsyncpa [#allocation6], 1 }
 0x133   :  { %322 = vsyncpa [#allocation9], 1 }
 0x134   :  { %323 = vsyncpa [#allocation4], 1 }

</bundles_post_ra>
